<compile_context>
chip_gen: v6e
topology: v6e:2x2x1
jax: 0.10.0
libtpu: 0.0.40
codegen_flags: <defaults>
</compile_context>

<pallas_src>
import jax
import jax.numpy as jnp
from jax.experimental import pallas as pl
from jax.experimental.pallas import tpu as pltpu

# ---- model hyper-parameters (small, consistent with the module) ----
B = 16                          # total batch
C, H, W = 1, 8, 8
INPUT_SIZE = (C, H, W)
INPUT_DIM = C * H * W           # 64
ENCODER_DIM = 64
DECODER_DIM = 64
Z_SIZE = 8
Z_HALF = Z_SIZE // 2            # 4
NUM_FLOWS = 2

MAX_TB = 256                    # cap rows per grid step for large batches

# fused-head column layout: [mu | var | u | w | b | s]  (zero-padded to 128)
H_MU = 0
H_VAR = H_MU + Z_SIZE                         # 8
H_U = H_VAR + Z_SIZE                          # 16
H_W = H_U + NUM_FLOWS * Z_HALF                # 24
H_B = H_W + NUM_FLOWS * Z_HALF                # 32
H_S = H_B + NUM_FLOWS                         # 34
HEADS_DIM = H_S + Z_SIZE                      # 42
HEADS_PAD = 128                               # lane-dense fused-head width

# packed input slab lane layout: [x (64) | eps (8) | 1 (bias lane) | 0-pad]
IN_X = 0
IN_EPS = INPUT_DIM                            # 64
IN_ONE = IN_EPS + Z_SIZE                      # 72
IN_WIDTH = 128

# packed-output lane layout: [x_mean | mu | var | z0 | zk | logdet | pad]
OFF_XMEAN = 0
OFF_MU = INPUT_DIM                            # 64
OFF_VAR = OFF_MU + Z_SIZE                     # 72
OFF_Z0 = OFF_VAR + Z_SIZE                     # 80
OFF_ZK = OFF_Z0 + Z_SIZE                      # 88
OFF_LOGDET = OFF_ZK + Z_SIZE                  # 96
OUT_WIDTH = 128                               # lane-dense output width
OUT_PAD = OUT_WIDTH - (OFF_LOGDET + 1)        # 31


def _round_up(n, m):
    return ((n + m - 1) // m) * m


# fused weight row counts (padded to bf16 sublane-packing multiples)
HEADS_ROWS = _round_up(ENCODER_DIM + 1, 16)   # 80 : 64 weight rows + bias row
DEC_ROWS = _round_up(Z_SIZE + 1, 16)          # 16 :  8 weight rows + bias row
PMU_ROWS = _round_up(DECODER_DIM + 1, 16)     # 80 : 64 weight rows + bias row


def _softplus(x):
    # numerically stable softplus (VPU + one EUP exp/log per element)
    return jnp.maximum(x, 0.0) + jnp.log(1.0 + jnp.exp(-jnp.abs(x)))


def _sigmoid(x):
    # sigmoid(x) = 0.5*(tanh(x/2)+1): single EUP op, no exact divide
    return 0.5 * (jnp.tanh(0.5 * x) + 1.0)


def nicevae_kernel(in_ref, w_in_ref, w_heads_ref, w_dec_ref, w_pmu_ref, out_ref):
    f32 = jnp.float32
    bf16 = jnp.bfloat16

    slab = in_ref[...]                                   # (TB, 128) f32
    eps = slab[:, IN_EPS:IN_EPS + Z_SIZE]                # (TB, Z)

    # --- encoder: h = tanh(slab @ W_in); encoder bias rides the ones-lane,
    #     eps lanes hit zero rows of W_in ---
    h = jnp.tanh(jnp.dot(slab.astype(bf16), w_in_ref[...],
                         preferred_element_type=f32))    # (TB, 64)

    # --- all six amortized heads in one wide matmul; bias = last weight row ---
    heads = (jnp.dot(h.astype(bf16), w_heads_ref[:ENCODER_DIM, :],
                     preferred_element_type=f32)
             + w_heads_ref[ENCODER_DIM:ENCODER_DIM + 1, :].astype(f32))

    mu = heads[:, H_MU:H_MU + Z_SIZE]
    # nn.Softplus() then nn.Hardtanh(min_val=1e-4, max_val=5.0)
    var = jnp.clip(_softplus(heads[:, H_VAR:H_VAR + Z_SIZE]), 1e-4, 5.0)
    u_all = heads[:, H_U:H_U + NUM_FLOWS * Z_HALF]
    w_all = heads[:, H_W:H_W + NUM_FLOWS * Z_HALF]
    b_all = heads[:, H_B:H_B + NUM_FLOWS]
    s = heads[:, H_S:H_S + Z_SIZE]

    # --- reparameterize: z0 = eps * sqrt(var) + mu ---
    z0 = eps * jnp.sqrt(var) + mu

    # --- NICE amortized coupling flows ---
    # TODO(synk): flows.Coupling_amor source unavailable; standard additive
    # coupling with log|det| = 0 (matches `self.log_det_j += 0`).
    z1 = z0[:, :Z_HALF]
    z2 = z0[:, Z_HALF:]
    for k in range(NUM_FLOWS):                 # NUM_FLOWS=2: tiny, kept inline
        u_k = u_all[:, k * Z_HALF:(k + 1) * Z_HALF]      # (TB, Z/2)
        w_k = w_all[:, k * Z_HALF:(k + 1) * Z_HALF]      # (TB, Z/2)
        b_k = b_all[:, k:k + 1]                          # (TB, 1)
        inner = jnp.sum(w_k * z1, axis=1, keepdims=True) + b_k
        z2 = z2 + u_k * jnp.tanh(inner)

    # --- Scaling_amor: z_k = z * exp(s), log_det = sum(s, dim=1) ---
    zk = jnp.concatenate([z1, z2], axis=1) * jnp.exp(s)  # (TB, Z)
    logdet = jnp.sum(s, axis=1, keepdims=True)           # (TB, 1)

    # --- decoder + p_mu head, biases = last weight rows ---
    hd = jnp.tanh(jnp.dot(zk.astype(bf16), w_dec_ref[:Z_SIZE, :],
                          preferred_element_type=f32)
                  + w_dec_ref[Z_SIZE:Z_SIZE + 1, :].astype(f32))
    logits = (jnp.dot(hd.astype(bf16), w_pmu_ref[:DECODER_DIM, :],
                      preferred_element_type=f32)
              + w_pmu_ref[DECODER_DIM:DECODER_DIM + 1, :].astype(f32))
    x_mean = _sigmoid(logits)                            # (TB, INPUT_DIM)

    # --- single lane-dense packed output store ---
    packed = jnp.concatenate(
        [x_mean, mu, var, z0, zk, logdet,
         jnp.zeros((slab.shape[0], OUT_PAD), f32)], axis=1)   # (TB, 128)
    out_ref[...] = packed


def init_params(key):
    """Deterministic synthetic parameters, fused/bias-folded, stored as bf16."""
    def lin(k, din, dout, scale=0.05):
        kw, kb = jax.random.split(k)
        w = scale * jax.random.normal(kw, (din, dout), jnp.float32)
        b = scale * jax.random.normal(kb, (1, dout), jnp.float32)
        return w, b

    keys = jax.random.split(key, 9)
    w_enc, b_enc = lin(keys[0], INPUT_DIM, ENCODER_DIM)            # encoder
    w_mu, b_mu = lin(keys[1], ENCODER_DIM, Z_SIZE)                 # mu
    w_var, b_var = lin(keys[2], ENCODER_DIM, Z_SIZE)               # var
    w_u, b_u = lin(keys[3], ENCODER_DIM, NUM_FLOWS * Z_HALF)       # amor_u
    w_w, b_w = lin(keys[4], ENCODER_DIM, NUM_FLOWS * Z_HALF)       # amor_w
    w_b, b_b = lin(keys[5], ENCODER_DIM, NUM_FLOWS)                # amor_b
    w_s, b_s = lin(keys[6], ENCODER_DIM, Z_SIZE)                   # amor_s
    w_dec, b_dec = lin(keys[7], Z_SIZE, DECODER_DIM)               # decoder
    w_pmu, b_pmu = lin(keys[8], DECODER_DIM, INPUT_DIM)            # p_mu

    # encoder weight consumes the whole 128-wide input slab:
    # rows [0:64]=W_enc, rows [64:72]=0 (eps lanes), row 72=b_enc (ones lane)
    w_in = jnp.zeros((IN_WIDTH, ENCODER_DIM), jnp.float32)
    w_in = w_in.at[IN_X:IN_X + INPUT_DIM, :].set(w_enc)
    w_in = w_in.at[IN_ONE, :].set(b_enc[0])

    # six head linears fused into one (64+bias, 128) matmul
    w_heads = jnp.concatenate([w_mu, w_var, w_u, w_w, w_b, w_s], axis=1)
    b_heads = jnp.concatenate([b_mu, b_var, b_u, b_w, b_b, b_s], axis=1)
    w_heads_fused = jnp.zeros((HEADS_ROWS, HEADS_PAD), jnp.float32)
    w_heads_fused = w_heads_fused.at[:ENCODER_DIM, :HEADS_DIM].set(w_heads)
    w_heads_fused = w_heads_fused.at[ENCODER_DIM, :HEADS_DIM].set(b_heads[0])

    w_dec_fused = jnp.zeros((DEC_ROWS, DECODER_DIM), jnp.float32)
    w_dec_fused = w_dec_fused.at[:Z_SIZE, :].set(w_dec)
    w_dec_fused = w_dec_fused.at[Z_SIZE, :].set(b_dec[0])

    w_pmu_fused = jnp.zeros((PMU_ROWS, INPUT_DIM), jnp.float32)
    w_pmu_fused = w_pmu_fused.at[:DECODER_DIM, :].set(w_pmu)
    w_pmu_fused = w_pmu_fused.at[DECODER_DIM, :].set(b_pmu[0])

    bf16 = jnp.bfloat16
    return (w_in.astype(bf16), w_heads_fused.astype(bf16),
            w_dec_fused.astype(bf16), w_pmu_fused.astype(bf16))


def nicevae_forward(x_nchw, eps, params):
    batch = x_nchw.shape[0]
    x_flat = x_nchw.reshape(batch, -1)          # torch .view(B, -1)

    # lane-dense input slab: [x | eps | 1 | 0-pad]  (single input DMA stream)
    slab = jnp.concatenate(
        [x_flat, eps, jnp.ones((batch, 1), jnp.float32),
         jnp.zeros((batch, IN_WIDTH - (IN_ONE + 1)), jnp.float32)], axis=1)

    tb = batch if batch <= MAX_TB else MAX_TB
    assert batch % tb == 0, "batch must be divisible by the batch tile"
    grid = (batch // tb,)

    def batch_map(i):
        return (i, 0)

    def resident_map(i):
        return (0, 0)

    in_specs = [pl.BlockSpec((tb, IN_WIDTH), batch_map)]      # packed x/eps slab
    for p in params:                                          # resident weights
        in_specs.append(pl.BlockSpec(p.shape, resident_map))

    out_spec = pl.BlockSpec((tb, OUT_WIDTH), batch_map)
    out_shape = jax.ShapeDtypeStruct((batch, OUT_WIDTH), jnp.float32)

    # advisory cost estimate (weights counted ONCE — they are resident)
    flops = 2 * batch * (IN_WIDTH * ENCODER_DIM
                         + ENCODER_DIM * HEADS_PAD
                         + Z_SIZE * DECODER_DIM
                         + DECODER_DIM * INPUT_DIM)
    transcendentals = batch * (ENCODER_DIM + DECODER_DIM + INPUT_DIM + 4 * Z_SIZE)
    weight_bytes = sum(int(p.size) * p.dtype.itemsize for p in params)
    bytes_accessed = batch * (IN_WIDTH + OUT_WIDTH) * 4 + weight_bytes

    semantics = ("arbitrary",) if grid[0] == 1 else ("parallel",)

    packed = pl.pallas_call(
        nicevae_kernel,
        out_shape=out_shape,
        grid=grid,
        in_specs=in_specs,
        out_specs=out_spec,
        compiler_params=pltpu.CompilerParams(dimension_semantics=semantics),
        cost_estimate=pl.CostEstimate(
            flops=flops,
            transcendentals=transcendentals,
            bytes_accessed=bytes_accessed),
    )(slab, *params)

    # unpack the lane-dense output buffer
    x_mean = packed[:, OFF_XMEAN:OFF_XMEAN + INPUT_DIM].reshape(-1, *INPUT_SIZE)
    z_mu = packed[:, OFF_MU:OFF_MU + Z_SIZE]
    z_var = packed[:, OFF_VAR:OFF_VAR + Z_SIZE]
    z0 = packed[:, OFF_Z0:OFF_Z0 + Z_SIZE]
    zk = packed[:, OFF_ZK:OFF_ZK + Z_SIZE]
    log_det_j = packed[:, OFF_LOGDET]           # torch.zeros([B]) + sum(s, 1)
    return x_mean, z_mu, z_var, log_det_j, z0, zk


if __name__ == "__main__":
    key = jax.random.PRNGKey(0)
    k_x, k_eps, k_p = jax.random.split(key, 3)

    x = jax.random.uniform(k_x, (B, C, H, W), jnp.float32)       # NCHW input
    eps = jax.random.normal(k_eps, (B, Z_SIZE), jnp.float32)     # reparam noise
    params = init_params(k_p)

    outs = nicevae_forward(x, eps, params)
    outs = jax.block_until_ready(outs)

    x_mean, z_mu, z_var, log_det_j, z0, zk = outs
    assert x_mean.shape == (B, C, H, W)
    assert z_mu.shape == (B, Z_SIZE) and z_var.shape == (B, Z_SIZE)
    assert log_det_j.shape == (B,)
    assert z0.shape == (B, Z_SIZE) and zk.shape == (B, Z_SIZE)
    assert bool(jnp.all(jnp.isfinite(x_mean)))
    assert bool(jnp.all(z_var >= 1e-4)) and bool(jnp.all(z_var <= 5.0))
    print("KERNEL_OK")
</pallas_src>

<mosaic_0001>
module attributes {stable_mosaic.version = 11 : i64} {
  func.func @nicevae_kernel(%arg0: i32, %arg1: memref<16x128xf32, #tpu.memory_space<vmem>>, %arg2: memref<128x64xbf16, #tpu.memory_space<vmem>>, %arg3: memref<80x128xbf16, #tpu.memory_space<vmem>>, %arg4: memref<16x64xbf16, #tpu.memory_space<vmem>>, %arg5: memref<80x64xbf16, #tpu.memory_space<vmem>>, %arg6: memref<16x128xf32, #tpu.memory_space<vmem>>) attributes {dimension_semantics = [#tpu.dimension_semantics<arbitrary>], iteration_bounds = array<i64: 1>, scalar_prefetch = 0 : i64, scratch_operands = 0 : i64, tpu.core_type = #tpu.core_type<tc>, window_params = [{transform_indices = @transform_0, window_bounds = array<i64: 16, 128>}, {pipeline_mode = #tpu.pipeline_mode<synchronous>, transform_indices = @transform_1, window_bounds = array<i64: 128, 64>}, {pipeline_mode = #tpu.pipeline_mode<synchronous>, transform_indices = @transform_2, window_bounds = array<i64: 80, 128>}, {pipeline_mode = #tpu.pipeline_mode<synchronous>, transform_indices = @transform_3, window_bounds = array<i64: 16, 64>}, {pipeline_mode = #tpu.pipeline_mode<synchronous>, transform_indices = @transform_4, window_bounds = array<i64: 80, 64>}, {transform_indices = @transform_5, window_bounds = array<i64: 16, 128>}]} {
    %c0 = arith.constant 0 : index
    %c0_0 = arith.constant 0 : index
    %0 = vector.load %arg1[%c0, %c0_0] : memref<16x128xf32, #tpu.memory_space<vmem>>, vector<16x128xf32>
    %1 = vector.extract_strided_slice %0 {offsets = [0, 64], sizes = [16, 8], strides = [1, 1]} : vector<16x128xf32> to vector<16x8xf32>
    %2 = arith.truncf %0 : vector<16x128xf32> to vector<16x128xbf16>
    %c0_1 = arith.constant 0 : index
    %c0_2 = arith.constant 0 : index
    %3 = vector.load %arg2[%c0_1, %c0_2] : memref<128x64xbf16, #tpu.memory_space<vmem>>, vector<128x64xbf16>
    %cst = arith.constant dense<0.000000e+00> : vector<16x64xf32>
    %4 = tpu.matmul %2, %3, %cst {dimension_numbers = #tpu.dot_dimension_numbers<[1], [0], [0], [1], [0, 0, 1, 1], [], []>} : vector<16x128xbf16>, vector<128x64xbf16>, vector<16x64xf32> -> vector<16x64xf32>
    %5 = math.tanh %4 : vector<16x64xf32>
    %6 = arith.truncf %5 : vector<16x64xf32> to vector<16x64xbf16>
    %c0_3 = arith.constant 0 : index
    %c0_4 = arith.constant 0 : index
    %7 = vector.load %arg3[%c0_3, %c0_4] : memref<80x128xbf16, #tpu.memory_space<vmem>>, vector<64x128xbf16>
    %cst_5 = arith.constant dense<0.000000e+00> : vector<16x128xf32>
    %8 = tpu.matmul %6, %7, %cst_5 {dimension_numbers = #tpu.dot_dimension_numbers<[1], [0], [0], [1], [0, 0, 1, 1], [], []>} : vector<16x64xbf16>, vector<64x128xbf16>, vector<16x128xf32> -> vector<16x128xf32>
    %c64 = arith.constant 64 : index
    %c0_6 = arith.constant 0 : index
    %9 = vector.load %arg3[%c64, %c0_6] : memref<80x128xbf16, #tpu.memory_space<vmem>>, vector<1x128xbf16>
    %10 = arith.extf %9 : vector<1x128xbf16> to vector<1x128xf32>
    %11 = vector.broadcast %10 : vector<1x128xf32> to vector<16x128xf32>
    %12 = arith.addf %8, %11 : vector<16x128xf32>
    %13 = vector.extract_strided_slice %12 {offsets = [0, 0], sizes = [16, 8], strides = [1, 1]} : vector<16x128xf32> to vector<16x8xf32>
    %14 = vector.extract_strided_slice %12 {offsets = [0, 8], sizes = [16, 8], strides = [1, 1]} : vector<16x128xf32> to vector<16x8xf32>
    %cst_7 = arith.constant 0.000000e+00 : f32
    %15 = vector.broadcast %cst_7 : f32 to vector<16x8xf32>
    %16 = arith.maximumf %14, %15 : vector<16x8xf32>
    %17 = math.absf %14 : vector<16x8xf32>
    %cst_8 = arith.constant 0.000000e+00 : f32
    %18 = vector.broadcast %cst_8 : f32 to vector<16x8xf32>
    %19 = arith.subf %18, %17 : vector<16x8xf32>
    %20 = math.exp %19 : vector<16x8xf32>
    %cst_9 = arith.constant 1.000000e+00 : f32
    %21 = vector.broadcast %cst_9 : f32 to vector<16x8xf32>
    %22 = arith.addf %21, %20 : vector<16x8xf32>
    %23 = math.log %22 : vector<16x8xf32>
    %24 = arith.addf %16, %23 : vector<16x8xf32>
    %cst_10 = arith.constant 9.99999974E-5 : f32
    %cst_11 = arith.constant 5.000000e+00 : f32
    %25 = vector.broadcast %cst_10 : f32 to vector<16x8xf32>
    %26 = arith.maximumf %25, %24 : vector<16x8xf32>
    %27 = vector.broadcast %cst_11 : f32 to vector<16x8xf32>
    %28 = arith.minimumf %27, %26 : vector<16x8xf32>
    %29 = vector.extract_strided_slice %12 {offsets = [0, 16], sizes = [16, 8], strides = [1, 1]} : vector<16x128xf32> to vector<16x8xf32>
    %30 = vector.extract_strided_slice %12 {offsets = [0, 24], sizes = [16, 8], strides = [1, 1]} : vector<16x128xf32> to vector<16x8xf32>
    %31 = vector.extract_strided_slice %12 {offsets = [0, 32], sizes = [16, 2], strides = [1, 1]} : vector<16x128xf32> to vector<16x2xf32>
    %32 = vector.extract_strided_slice %12 {offsets = [0, 34], sizes = [16, 8], strides = [1, 1]} : vector<16x128xf32> to vector<16x8xf32>
    %33 = math.sqrt %28 : vector<16x8xf32>
    %34 = arith.mulf %1, %33 : vector<16x8xf32>
    %35 = arith.addf %34, %13 : vector<16x8xf32>
    %36 = vector.extract_strided_slice %35 {offsets = [0, 0], sizes = [16, 4], strides = [1, 1]} : vector<16x8xf32> to vector<16x4xf32>
    %37 = vector.extract_strided_slice %35 {offsets = [0, 4], sizes = [16, 4], strides = [1, 1]} : vector<16x8xf32> to vector<16x4xf32>
    %38 = vector.extract_strided_slice %29 {offsets = [0, 0], sizes = [16, 4], strides = [1, 1]} : vector<16x8xf32> to vector<16x4xf32>
    %39 = vector.extract_strided_slice %30 {offsets = [0, 0], sizes = [16, 4], strides = [1, 1]} : vector<16x8xf32> to vector<16x4xf32>
    %40 = vector.extract_strided_slice %31 {offsets = [0, 0], sizes = [16, 1], strides = [1, 1]} : vector<16x2xf32> to vector<16x1xf32>
    %41 = arith.mulf %39, %36 : vector<16x4xf32>
    %cst_12 = arith.constant dense<0.000000e+00> : vector<16xf32>
    %42 = vector.multi_reduction <add>, %41, %cst_12 [1] : vector<16x4xf32> to vector<16xf32>
    %43 = vector.shape_cast %42 : vector<16xf32> to vector<16x1xf32>
    %44 = arith.addf %43, %40 : vector<16x1xf32>
    %45 = math.tanh %44 : vector<16x1xf32>
    %46 = vector.broadcast %45 : vector<16x1xf32> to vector<16x4xf32>
    %47 = arith.mulf %38, %46 : vector<16x4xf32>
    %48 = arith.addf %37, %47 : vector<16x4xf32>
    %49 = vector.extract_strided_slice %29 {offsets = [0, 4], sizes = [16, 4], strides = [1, 1]} : vector<16x8xf32> to vector<16x4xf32>
    %50 = vector.extract_strided_slice %30 {offsets = [0, 4], sizes = [16, 4], strides = [1, 1]} : vector<16x8xf32> to vector<16x4xf32>
    %51 = vector.extract_strided_slice %31 {offsets = [0, 1], sizes = [16, 1], strides = [1, 1]} : vector<16x2xf32> to vector<16x1xf32>
    %52 = arith.mulf %50, %36 : vector<16x4xf32>
    %cst_13 = arith.constant dense<0.000000e+00> : vector<16xf32>
    %53 = vector.multi_reduction <add>, %52, %cst_13 [1] : vector<16x4xf32> to vector<16xf32>
    %54 = vector.shape_cast %53 : vector<16xf32> to vector<16x1xf32>
    %55 = arith.addf %54, %51 : vector<16x1xf32>
    %56 = math.tanh %55 : vector<16x1xf32>
    %57 = vector.broadcast %56 : vector<16x1xf32> to vector<16x4xf32>
    %58 = arith.mulf %49, %57 : vector<16x4xf32>
    %59 = arith.addf %48, %58 : vector<16x4xf32>
    %60 = tpu.concatenate %36, %59 in 1 : vector<16x4xf32>, vector<16x4xf32> -> vector<16x8xf32>
    %61 = math.exp %32 : vector<16x8xf32>
    %62 = arith.mulf %60, %61 : vector<16x8xf32>
    %cst_14 = arith.constant dense<0.000000e+00> : vector<16xf32>
    %63 = vector.multi_reduction <add>, %32, %cst_14 [1] : vector<16x8xf32> to vector<16xf32>
    %64 = vector.shape_cast %63 : vector<16xf32> to vector<16x1xf32>
    %65 = arith.truncf %62 : vector<16x8xf32> to vector<16x8xbf16>
    %c0_15 = arith.constant 0 : index
    %c0_16 = arith.constant 0 : index
    %66 = vector.load %arg4[%c0_15, %c0_16] : memref<16x64xbf16, #tpu.memory_space<vmem>>, vector<8x64xbf16>
    %cst_17 = arith.constant dense<0.000000e+00> : vector<16x64xf32>
    %67 = tpu.matmul %65, %66, %cst_17 {dimension_numbers = #tpu.dot_dimension_numbers<[1], [0], [0], [1], [0, 0, 1, 1], [], []>} : vector<16x8xbf16>, vector<8x64xbf16>, vector<16x64xf32> -> vector<16x64xf32>
    %c8 = arith.constant 8 : index
    %c0_18 = arith.constant 0 : index
    %68 = vector.load %arg4[%c8, %c0_18] : memref<16x64xbf16, #tpu.memory_space<vmem>>, vector<1x64xbf16>
    %69 = arith.extf %68 : vector<1x64xbf16> to vector<1x64xf32>
    %70 = vector.broadcast %69 : vector<1x64xf32> to vector<16x64xf32>
    %71 = arith.addf %67, %70 : vector<16x64xf32>
    %72 = math.tanh %71 : vector<16x64xf32>
    %73 = arith.truncf %72 : vector<16x64xf32> to vector<16x64xbf16>
    %c0_19 = arith.constant 0 : index
    %c0_20 = arith.constant 0 : index
    %74 = vector.load %arg5[%c0_19, %c0_20] : memref<80x64xbf16, #tpu.memory_space<vmem>>, vector<64x64xbf16>
    %cst_21 = arith.constant dense<0.000000e+00> : vector<16x64xf32>
    %75 = tpu.matmul %73, %74, %cst_21 {dimension_numbers = #tpu.dot_dimension_numbers<[1], [0], [0], [1], [0, 0, 1, 1], [], []>} : vector<16x64xbf16>, vector<64x64xbf16>, vector<16x64xf32> -> vector<16x64xf32>
    %c64_22 = arith.constant 64 : index
    %c0_23 = arith.constant 0 : index
    %76 = vector.load %arg5[%c64_22, %c0_23] : memref<80x64xbf16, #tpu.memory_space<vmem>>, vector<1x64xbf16>
    %77 = arith.extf %76 : vector<1x64xbf16> to vector<1x64xf32>
    %78 = vector.broadcast %77 : vector<1x64xf32> to vector<16x64xf32>
    %79 = arith.addf %75, %78 : vector<16x64xf32>
    %cst_24 = arith.constant 5.000000e-01 : f32
    %80 = vector.broadcast %cst_24 : f32 to vector<16x64xf32>
    %81 = arith.mulf %80, %79 : vector<16x64xf32>
    %82 = math.tanh %81 : vector<16x64xf32>
    %cst_25 = arith.constant 1.000000e+00 : f32
    %83 = vector.broadcast %cst_25 : f32 to vector<16x64xf32>
    %84 = arith.addf %82, %83 : vector<16x64xf32>
    %cst_26 = arith.constant 5.000000e-01 : f32
    %85 = vector.broadcast %cst_26 : f32 to vector<16x64xf32>
    %86 = arith.mulf %85, %84 : vector<16x64xf32>
    %cst_27 = arith.constant 0.000000e+00 : f32
    %87 = vector.broadcast %cst_27 : f32 to vector<16x31xf32>
    %88 = tpu.concatenate %86, %13, %28, %35, %62, %64, %87 in 1 : vector<16x64xf32>, vector<16x8xf32>, vector<16x8xf32>, vector<16x8xf32>, vector<16x8xf32>, vector<16x1xf32>, vector<16x31xf32> -> vector<16x128xf32>
    %c0_28 = arith.constant 0 : index
    %c0_29 = arith.constant 0 : index
    %89 = vector.load %arg6[%c0_28, %c0_29] : memref<16x128xf32, #tpu.memory_space<vmem>>, vector<16x128xf32>
    tpu.vector_store %arg6[%c0_28, %c0_29], %88 {strides = array<i32>} : memref<16x128xf32, #tpu.memory_space<vmem>>, vector<16x128xf32>,
    return
  }
  func.func @transform_0(%arg0: i32) -> (i32, i32) {
    %c0_i32 = arith.constant 0 : i32
    %c0_i32_0 = arith.constant 0 : i32
    return %arg0, %c0_i32 : i32, i32
  }
  func.func @transform_1(%arg0: i32) -> (i32, i32) {
    %c0_i32 = arith.constant 0 : i32
    %c0_i32_0 = arith.constant 0 : i32
    %c0_i32_1 = arith.constant 0 : i32
    return %c0_i32, %c0_i32_0 : i32, i32
  }
  func.func @transform_2(%arg0: i32) -> (i32, i32) {
    %c0_i32 = arith.constant 0 : i32
    %c0_i32_0 = arith.constant 0 : i32
    %c0_i32_1 = arith.constant 0 : i32
    return %c0_i32, %c0_i32_0 : i32, i32
  }
  func.func @transform_3(%arg0: i32) -> (i32, i32) {
    %c0_i32 = arith.constant 0 : i32
    %c0_i32_0 = arith.constant 0 : i32
    %c0_i32_1 = arith.constant 0 : i32
    return %c0_i32, %c0_i32_0 : i32, i32
  }
  func.func @transform_4(%arg0: i32) -> (i32, i32) {
    %c0_i32 = arith.constant 0 : i32
    %c0_i32_0 = arith.constant 0 : i32
    %c0_i32_1 = arith.constant 0 : i32
    return %c0_i32, %c0_i32_0 : i32, i32
  }
  func.func @transform_5(%arg0: i32) -> (i32, i32) {
    %c0_i32 = arith.constant 0 : i32
    %c0_i32_0 = arith.constant 0 : i32
    return %arg0, %c0_i32 : i32, i32
  }
}

</mosaic_0001>

<bundles_post_ra>
// kernel: tpu_custom_call.1
= control target key start
LH: loop header
LB: loop body
LE: loop exit
PB: predicated region body
PF: predicated region fallthrough
CT: control target
= control target key end

     0   :  { %v805_v1 = vmov 0.0   ;;  %vm806_vm0 = vmmov 0   ;;  %s1055_s0 = inlined_call_operand.vmem [shape: f32[16,128], index: 0, kind: input, shape index: {}]   ;;  %s1056_s1 = inlined_call_operand.vmem [shape: bf16[128,64], index: 1, kind: input, shape index: {}]   ;;  %s1057_s2 = inlined_call_operand.vmem [shape: bf16[80,128], index: 2, kind: input, shape index: {}]   ;;  %s1058_s3 = inlined_call_operand.vmem [shape: bf16[16,64], index: 3, kind: input, shape index: {}]   ;;  %s1059_s4 = inlined_call_operand.vmem [shape: bf16[80,64], index: 4, kind: input, shape index: {}]   ;;  %s1060_s5 = inlined_call_operand.hbm [shape: f32[16,128], index: 5, kind: output, shape index: {}]  }
   0x1   :  { %v731_v0 = vld [vmem:[%s1056_s1 + $0x38] sm:$0xff]   ;;  %660 = vmatprep.subr.bf16.mxu0 %v805_v1  ;;  %680 = vmatprep.subr.bf16.mxu1 %v805_v1  ;;  %v732_v2 = vld [vmem:[%s1056_s1 + $0x30] sm:$0xff]   ;;  %v733_v3 = vld [vmem:[%s1056_s1 + $0x28] sm:$0xff]  }
   0x2   :  { %661 = vmatpush3.bf16.msra.mxu0 %v731_v0  ;;  %676 = vmatprep.mubr.msk.bf16.mxu0 %vm806_vm0, %v805_v1  ;;  %v734_v4 = vld [vmem:[%s1056_s1 + $0x20] sm:$0xff]   ;;  %v735_v5 = vld [vmem:[%s1056_s1 + $0x18] sm:$0xff]  }
   0x3   :  { %662 = vmatprep.subr.bf16.mxu0 %v805_v1  ;;  %688 = vmatprep.mubr.msk.bf16.mxu1 %vm806_vm0, %v805_v1 }
   0x6   :  { %663 = vmatpush3.bf16.msra.mxu0 %v732_v2 }
   0x7   :  { %664 = vmatprep.subr.bf16.mxu0 %v805_v1 }
   0xa   :  { %665 = vmatpush3.bf16.msra.mxu0 %v733_v3 }
   0xb   :  { %666 = vmatprep.subr.bf16.mxu0 %v805_v1 }
   0xe   :  { %667 = vmatpush3.bf16.msra.mxu0 %v734_v4 }
   0xf   :  { %10 = vsyncpa [#allocation3], 0  ;;  %668 = vmatprep.subr.bf16.mxu0 %v805_v1  ;;  %v736_v6 = vld [vmem:[%s1056_s1 + $0x10] sm:$0xff]   ;;  %v737_v7 = vld [vmem:[%s1056_s1 + $0x8] sm:$0xff]   ;;  %vm171_vm1 = vcmask 523264   ;;  %v143_v23 = vlaneseq  ;;  %s807_s21 = smov 64  }
  0x10   :  { %v738_v8 = vld [vmem:[%s1056_s1] sm:$0xff]   ;;  %v896_v10 = vld [vmem:[%s1055_s0 + $0x8] sm:$0xff]  ;;  %v739_v12 = vld [vmem:[%s1057_s2 + $0x18] sm:$0xff]   ;;  %s809_s22 = smov 88   ;;  %s810_s23 = smov 92   ;;  %vm290_vm6 = vcmask 31744  }
  0x11   :  { %v891_v9 = vld [vmem:[%s1055_s0] sm:$0xff]  ;;  %681 = vmatpush3.bf16.msra.mxu1 %v739_v12  ;;  %v740_v13 = vld [vmem:[%s1057_s2 + $0x10] sm:$0xff]   ;;  %v741_v14 = vld [vmem:[%s1057_s2 + $0x8] sm:$0xff]   ;;  %v144_v24 = vshrl.u32 %v143_v23, 7  ;;  %s811_s24 = smov 104   ;;  %s812_s25 = smov 100  }
  0x12   :  { %669 = vmatpush3.bf16.msra.mxu0 %v735_v5  ;;  %v24_v11 = vpack.c.bf16 %v896_v10, %v891_v9  ;;  %682 = vmatprep.subr.bf16.mxu1 %v805_v1  ;;  %v742_v15 = vld [vmem:[%s1057_s2] sm:$0xff]   ;;  %s815_s26 = smov 52   ;;  %s816_s27 = smov 48   ;;  %vm425_vm7 = vcmask 1043456   ;;  %vm407_vm8 = vcmask 64512   ;;  %vm587_vm9 = vcmask 588800  }
  0x13   :  { %670 = vmatprep.subr.bf16.mxu0 %v805_v1  ;;  %v141_v25 = vld [vmem:[%s1057_s2 + $0x20] sm:$0x1]  ;;  %v923_v27 = vsub.s32 0, %v144_v24  ;;  %s808_s2 = smov 56   ;;  %s817_s30 = smov 94   ;;  %vm590_vm10 = vcmask 654336  }
  0x14   :  { %v142_v26 = vunpack.c.l.bf16 %v141_v25  ;;  %s818_s6 = smov 16   ;;  %vm593_vm11 = vcmask 719872   ;;  %vm596_vm12 = vcmask 785408   ;;  %vm599_vm13 = vcmask 793600  }
  0x15   :  { %683 = vmatpush3.bf16.msra.mxu1 %v740_v13 }
  0x16   :  { %671 = vmatpush3.bf16.msra.mxu0 %v736_v6  ;;  %684 = vmatprep.subr.bf16.mxu1 %v805_v1  ;;  %v146_v28 = vrot.slane %v142_v26, %v923_v27 }
  0x17   :  { %672 = vmatprep.subr.bf16.mxu0 %v805_v1 }
  0x19   :  { %685 = vmatpush3.bf16.msra.mxu1 %v741_v14 }
  0x1a   :  { %673 = vmatpush3.bf16.msra.mxu0 %v737_v7  ;;  %686 = vmatprep.subr.bf16.mxu1 %v805_v1 }
  0x1b   :  { %674 = vmatprep.subr.bf16.mxu0 %v805_v1 }
  0x1d   :  { %687 = vmatpush3.bf16.msra.mxu1 %v742_v15 }
  0x1e   :  { %675 = vmatpush3.bf16.msra.mxu0 %v738_v8  ;;  %692 = vmatprep.subr.bf16.mxu1 %v805_v1 }
  0x21   :  { %677 = vmatmul.mubr.bf16.vlgmr.msra.gmra.mxu0 %v24_v11 }
  0xe1   :  { %v123_v16 = vpop.f32.mrf.mxu0 }
  0xe2   :  { %747 = vtanh.f32 %v123_v16 }
  0xe3   :  { %v678_v17 = vpop.f32.mrf.mxu0 }
  0xe5   :  { %v126_v18 = vpop.f32.mrf.mxu0 }
  0xe6   :  { %749 = vtanh.f32 %v126_v18 }
  0xe7   :  { %v679_v19 = vpop.f32.mrf.mxu0 }
  0xef   :  { %v748_v20 = vpop.eup %747 }
  0xf3   :  { %v750_v21 = vpop.eup %749 }
  0xf4   :  { %v132_v22 = vpack.c.bf16 %v750_v21, %v748_v20 }
  0xf6   :  { %689 = vmatmul.mubr.msk.bf16.vlgmr.msra.gmra.mxu1 %vm171_vm1, %v132_v22 }
  0xf7   :  { %694 = vmatprep.mubr.msk.bf16.mxu1 %vm806_vm0, %v805_v1 }
 0x1b6   :  { %v209_v29 = vpop.f32.mrf.mxu1 }
 0x1b7   :  { %v926_v30 = vadd.f32 %v209_v29, %v146_v28  ;;  %v813_v29 = vmov 32  }
 0x1b8   :  { %v690_v31 = vpop.f32.mrf.mxu1  ;;  %727 = vset.pattern.permute.xlu1 %v813_v29  ;;  %728 = vset.pattern.permute.xlu0 %v813_v29 }
 0x1b9   :  { %264 = vrot.lane.b32.xlu1 %v926_v30, %s807_s21  ;;  %v218_v32 = vand.u32 2147483647, %v926_v30  ;;  %v216_v46 = vmax.f32 %v926_v30, 0.0 }
 0x1ba   :  { %v212_v33 = vpop.f32.mrf.mxu1 }
 0x1bb   :  { %v931_v34 = vadd.f32 %v212_v33, %v146_v28  ;;  %v220_v35 = vsub.f32 0.0, %v218_v32 }
 0x1bc   :  { %v691_v36 = vpop.f32.mrf.mxu1 }
 0x1bd   :  { %266 = vrot.lane.b32.xlu1 %v931_v34, %s807_s21  ;;  %v222_v37 = vmul.f32 1.442695, %v220_v35  ;;  %v219_v38 = vand.u32 2147483647, %v931_v34  ;;  %v217_v51 = vmax.f32 %v931_v34, 0.0 }
 0x1bf   :  { %751 = vpow2.f32 %v222_v37  ;;  %v221_v39 = vsub.f32 0.0, %v219_v38 }
 0x1c1   :  { %v224_v40 = vmul.f32 1.442695, %v221_v39 }
 0x1c3   :  { %753 = vpow2.f32 %v224_v40 }
 0x1cc   :  { %v752_v41 = vpop.eup %751 }
 0x1cd   :  { %v226_v42 = vadd.f32 1.0, %v752_v41 }
 0x1cf   :  { %755 = vlog2.f32 %v226_v42 }
 0x1d0   :  { %v754_v43 = vpop.eup %753 }
 0x1d1   :  { %v227_v44 = vadd.f32 1.0, %v754_v43  ;;  %v814_v43 = vmov 33  }
 0x1d3   :  { %757 = vlog2.f32 %v227_v44 }
 0x1dc   :  { %v756_v45 = vpop.eup %755 }
 0x1dd   :  { %v229_v47 = vmul.f32 0.6931472, %v756_v45 }
 0x1df   :  { %v232_v48 = vadd.f32 %v229_v47, %v216_v46 }
 0x1e0   :  { %v758_v49 = vpop.eup %757 }
 0x1e1   :  { %v234_v50 = vmax.f32 %v232_v48, 0.0001  ;;  %v231_v52 = vmul.f32 0.6931472, %v758_v49 }
 0x1e3   :  { %v938_v53 = vmin.f32 %v234_v50, 5.0  ;;  %v233_v54 = vadd.f32 %v231_v52, %v217_v51 }
 0x1e5   :  { %759 = vrsqrt.f32 %v938_v53  ;;  %v235_v55 = vmax.f32 %v233_v54, 0.0001  ;;  %vm240_vm2 = vcmp.eq.f32.partialorder %v938_v53, inf  ;;  %v243_v59 = vand.u32 2147483648, %v938_v53 }
 0x1e6   :  { %vm242_vm3 = vcmp.eq.f32.partialorder %v938_v53, 0.0  ;;  %v387_v54 = vmul.f32 1.442695, %v926_v30 }
 0x1e7   :  { %v941_v56 = vmin.f32 %v235_v55, 5.0 }
 0x1e9   :  { %761 = vrsqrt.f32 %v941_v56  ;;  %vm247_vm4 = vcmp.eq.f32.partialorder %v941_v56, inf  ;;  %v250_v0 = vand.u32 2147483648, %v941_v56  ;;  %vm249_vm5 = vcmp.eq.f32.partialorder %v941_v56, 0.0 }
 0x1f2   :  { %v760_v57 = vpop.eup %759 }
 0x1f3   :  { %v239_v58 = vmul.f32 %v760_v57, %v938_v53  ;;  %v389_v57 = vmul.f32 1.442695, %v931_v34 }
 0x1f5   :  { %v241_v60 = vsel %vm240_vm2, %v938_v53, %v239_v58  ;;  %v415_v58 = vld [vmem:[%s1058_s3] sm:$0xf] }
 0x1f6   :  { %v244_v61 = vsel %vm242_vm3, %v243_v59, %v241_v60  ;;  %v762_v62 = vpop.eup %761  ;;  %v427_v59 = vsel %vm425_vm7, %v415_v58, 0 }
 0x1f7   :  { %254 = vrot.lane.b32.xlu0 %v244_v61, %s808_s2  ;;  %v246_v63 = vmul.f32 %v762_v62, %v941_v56  ;;  %693 = vmatpush3.bf16.msra.mxu1 %v427_v59 }
 0x1f8   :  { %698 = vmatprep.subr.bf16.mxu1 %v805_v1 }
 0x1f9   :  { %v248_v2 = vsel %vm247_vm4, %v941_v56, %v246_v63 }
 0x1fa   :  { %v251_v3 = vsel %vm249_vm5, %v250_v0, %v248_v2 }
 0x1fb   :  { %256 = vrot.lane.b32.xlu0 %v251_v3, %s808_s2 }
 0x22b   :  { %v954_v5 = vpop.permute.xlu1 %264 }
 0x22f   :  { %v963_v12 = vpop.permute.xlu1 %266 }
 0x269   :  { %v255_v4 = vpop.permute.xlu0 %254 }
 0x26a   :  { %v260_v6 = vmul.f32 %v255_v4, %v891_v9 }
 0x26c   :  { %v958_v7 = vadd.f32 %v954_v5, %v260_v6 }
 0x26d   :  { %v257_v8 = vpop.permute.xlu0 %256 }
 0x26e   :  { %274 = vrot.lane.b32.xlu0 %v958_v7, %s809_s22  ;;  %v261_v11 = vmul.f32 %v257_v8, %v896_v10 }
 0x270   :  { %v966_v13 = vadd.f32 %v963_v12, %v261_v11 }
 0x272   :  { %323 = vrot.lane.b32.xlu0 %v958_v7, %s810_s23  ;;  %276 = vrot.lane.b32.xlu1 %v966_v13, %s809_s22 }
 0x276   :  { %325 = vrot.lane.b32.xlu1 %v966_v13, %s810_s23 }
 0x2e0   :  { %v275_v9 = vpop.permute.xlu0 %274 }
 0x2e1   :  { %v280_v14 = vmul.f32 %v275_v9, %v926_v30 }
 0x2e3   :  { %284 = vrot.lane.b32.xlu0 %v280_v14, %s811_s24 }
 0x2e4   :  { %v324_v15 = vpop.permute.xlu0 %323  ;;  %v277_v10 = vpop.permute.xlu1 %276 }
 0x2e5   :  { %v329_v16 = vmul.f32 %v324_v15, %v926_v30  ;;  %v281_v17 = vmul.f32 %v277_v10, %v931_v34 }
 0x2e7   :  { %333 = vrot.lane.b32.xlu0 %v329_v16, %s812_s25  ;;  %286 = vrot.lane.b32.xlu1 %v281_v17, %s811_s24 }
 0x2e8   :  { %v326_v18 = vpop.permute.xlu1 %325 }
 0x2e9   :  { %v330_v19 = vmul.f32 %v326_v18, %v931_v34 }
 0x2eb   :  { %335 = vrot.lane.b32.xlu1 %v330_v19, %s812_s25 }
 0x355   :  { %v285_v20 = vpop.permute.xlu0 %284 }
 0x356   :  { %v291_v21 = vsel %vm290_vm6, %v285_v20, 0.0 }
 0x357   :  { %292 = vadd.xlane.f32.xlu0 %v291_v21 }
 0x359   :  { %v334_v22 = vpop.permute.xlu0 %333  ;;  %v287_v23 = vpop.permute.xlu1 %286 }
 0x35a   :  { %v339_v24 = vsel %vm290_vm6, %v334_v22, 0.0  ;;  %v294_v25 = vsel %vm290_vm6, %v287_v23, 0.0  ;;  %v743_v23 = vld [vmem:[%s1059_s4 + $0x18] sm:$0xff]  }
 0x35b   :  { %340 = vadd.xlane.f32.xlu0 %v339_v24  ;;  %295 = vadd.xlane.f32.xlu1 %v294_v25 }
 0x35d   :  { %v336_v26 = vpop.permute.xlu1 %335 }
 0x35e   :  { %v342_v28 = vsel %vm290_vm6, %v336_v26, 0.0 }
 0x35f   :  { %343 = vadd.xlane.f32.xlu0 %v342_v28 }
 0x3e0   :  { %v293_v31 = vpop.xlane.xlu0 %292 }
 0x3e1   :  { %v297_v32 = vadd.f32 %v293_v31, %v926_v30 }
 0x3e3   :  { %763 = vtanh.f32 %v297_v32 }
 0x3e4   :  { %v341_v33 = vpop.xlane.xlu0 %340  ;;  %v296_v35 = vpop.xlane.xlu1 %295 }
 0x3e5   :  { %v345_v36 = vadd.f32 %v341_v33, %v926_v30  ;;  %v298_v37 = vadd.f32 %v296_v35, %v931_v34 }
 0x3e7   :  { %765 = vtanh.f32 %v345_v36 }
 0x3e8   :  { %767 = vtanh.f32 %v298_v37  ;;  %v344_v38 = vpop.xlane.xlu0 %343 }
 0x3e9   :  { %v346_v39 = vadd.f32 %v344_v38, %v931_v34 }
 0x3eb   :  { %769 = vtanh.f32 %v346_v39 }
 0x3ec   :  { %771 = vpow2.f32 %v387_v54 }
 0x3ed   :  { %773 = vpow2.f32 %v389_v57 }
 0x3f0   :  { %v764_v40 = vpop.eup %763 }
 0x3f1   :  { %303 = vperm.xlu1 %727, %v764_v40  }
 0x3f4   :  { %v766_v41 = vpop.eup %765 }
 0x3f5   :  { %v768_v42 = vpop.eup %767  ;;  %729 = vset.pattern.permute.xlu1 %v814_v43 }
 0x3f6   :  { %308 = vperm.xlu0 %728, %v768_v42   ;;  %351 = vperm.xlu1 %729, %v766_v41  }
 0x3f8   :  { %v770_v44 = vpop.eup %769 }
 0x3f9   :  { %v772_v0 = vpop.eup %771 }
 0x3fa   :  { %356 = vperm.xlu1 %729, %v770_v44   ;;  %730 = vset.pattern.permute.xlu0 %v814_v43  ;;  %v774_v6 = vpop.eup %773 }
 0x46c   :  { %v304_v45 = vpop.permute.xlu1 %303 }
 0x46d   :  { %v311_v46 = vmul.f32 %v304_v45, %v926_v30 }
 0x46f   :  { %315 = vrot.lane.b32.xlu1 %v311_v46, %s815_s26 }
 0x471   :  { %v352_v47 = vpop.permute.xlu1 %351  ;;  %v309_v49 = vpop.permute.xlu0 %308 }
 0x472   :  { %v359_v48 = vmul.f32 %v352_v47, %v926_v30  ;;  %v312_v50 = vmul.f32 %v309_v49, %v931_v34 }
 0x474   :  { %363 = vrot.lane.b32.xlu1 %v359_v48, %s816_s27 }
 0x475   :  { %v357_v51 = vpop.permute.xlu1 %356 }
 0x476   :  { %v360_v52 = vmul.f32 %v357_v51, %v931_v34 }
 0x478   :  { %317 = vrot.lane.b32.xlu1 %v312_v50, %s815_s26 }
 0x47c   :  { %365 = vrot.lane.b32.xlu1 %v360_v52, %s816_s27 }
 0x480   :  { %371 = vrot.lane.b32.xlu1 %v958_v7, %s807_s21 }
 0x484   :  { %373 = vrot.lane.b32.xlu1 %v966_v13, %s807_s21 }
 0x4e1   :  { %v316_v55 = vpop.permute.xlu1 %315 }
 0x4e2   :  { %v321_v60 = vadd.f32 %v316_v55, %v958_v7 }
 0x4e6   :  { %v364_v61 = vpop.permute.xlu1 %363 }
 0x4e7   :  { %v369_v62 = vadd.f32 %v364_v61, %v321_v60 }
 0x4e9   :  { %379 = vrot.lane.b32.xlu0 %v369_v62, %s807_s21 }
 0x4ea   :  { %v318_v63 = vpop.permute.xlu1 %317 }
 0x4eb   :  { %v322_v2 = vadd.f32 %v318_v63, %v966_v13 }
 0x4ed   :  { %393 = vrot.lane.b32.xlu0 %v772_v0, %s817_s30 }
 0x4ee   :  { %v366_v3 = vpop.permute.xlu1 %365 }
 0x4ef   :  { %v370_v4 = vadd.f32 %v366_v3, %v322_v2 }
 0x4f1   :  { %401 = vrot.lane.b32.xlu0 %v926_v30, %s817_s30  ;;  %381 = vrot.lane.b32.xlu1 %v370_v4, %s807_s21 }
 0x4f2   :  { %v372_v8 = vpop.permute.xlu1 %371 }
 0x4f5   :  { %395 = vrot.lane.b32.xlu1 %v774_v6, %s817_s30 }
 0x4f6   :  { %v374_v9 = vpop.permute.xlu1 %373 }
 0x4f9   :  { %403 = vrot.lane.b32.xlu1 %v931_v34, %s817_s30 }
 0x55b   :  { %v380_v11 = vpop.permute.xlu0 %379 }
 0x55c   :  { %v385_v17 = vsel %vm290_vm6, %v372_v8, %v380_v11 }
 0x55f   :  { %v394_v14 = vpop.permute.xlu0 %393 }
 0x560   :  { %v399_v19 = vmul.f32 %v394_v14, %v385_v17 }
 0x563   :  { %v382_v15 = vpop.permute.xlu1 %381  ;;  %v402_v10 = vpop.permute.xlu0 %401 }
 0x564   :  { %v408_v16 = vsel %vm407_vm8, %v402_v10, 0.0  ;;  %v386_v18 = vsel %vm290_vm6, %v374_v9, %v382_v15 }
 0x565   :  { %409 = vadd.xlane.f32.xlu0 %v408_v16 }
 0x567   :  { %v396_v30 = vpop.permute.xlu1 %395 }
 0x568   :  { %v400_v20 = vmul.f32 %v396_v30, %v386_v18 }
 0x56a   :  { %v414_v21 = vpack.c.bf16 %v400_v20, %v399_v19 }
 0x56b   :  { %v404_v22 = vpop.permute.xlu1 %403 }
 0x56c   :  { %695 = vmatmul.mubr.msk.bf16.vlgmr.msra.gmra.mxu1 %vm407_vm8, %v414_v21  ;;  %v411_v34 = vsel %vm407_vm8, %v404_v22, 0.0 }
 0x56d   :  { %412 = vadd.xlane.f32.xlu1 %v411_v34  ;;  %706 = vmatprep.mubr.msk.bf16.mxu1 %vm806_vm0, %v805_v1 }
 0x56e   :  { %699 = vmatpush3.bf16.msra.mxu1 %v743_v23 }
 0x56f   :  { %700 = vmatprep.subr.bf16.mxu1 %v805_v1 }
 0x57b   :  { %565 = vrot.lane.b32.xlu0 %v938_v53, %s807_s21  ;;  %v744_v53 = vld [vmem:[%s1059_s4 + $0x10] sm:$0xff]  }
 0x57c   :  { %701 = vmatpush3.bf16.msra.mxu1 %v744_v53 }
 0x57d   :  { %702 = vmatprep.subr.bf16.mxu1 %v805_v1 }
 0x57e   :  { %567 = vrot.lane.b32.xlu1 %v941_v56, %s807_s21  ;;  %v745_v56 = vld [vmem:[%s1059_s4 + $0x8] sm:$0xff]  }
 0x57f   :  { %571 = vrot.lane.b32.xlu0 %v958_v7, %s818_s6  ;;  %v746_v7 = vld [vmem:[%s1059_s4] sm:$0xff]  }
 0x580   :  { %703 = vmatpush3.bf16.msra.mxu1 %v745_v56 }
 0x581   :  { %704 = vmatprep.subr.bf16.mxu1 %v805_v1  ;;  %v481_v1 = vld [vmem:[%s1059_s4 + $0x20] sm:$0x1] }
 0x582   :  { %573 = vrot.lane.b32.xlu1 %v966_v13, %s818_s6  ;;  %v416_v13 = vld [vmem:[%s1058_s3 + $0x4] sm:$0x1]  ;;  %v482_v38 = vunpack.c.l.bf16 %v481_v1  ;;  %s819_s3 = smov [#allocation2]  }
 0x583   :  { %579 = vrot.lane.b32.xlu0 %v399_v19, %s809_s22  ;;  %v417_v24 = vunpack.c.l.bf16 %v416_v13  ;;  %s609_s4 = sshll.u32 %s819_s3, 4  ;;  %s610_s4 = int_to_ptr.vmem [resolvable:$true] %s609_s4 }
 0x584   :  { %705 = vmatpush3.bf16.msra.mxu1 %v746_v7  ;;  %v486_v39 = vrot.slane %v482_v38, %v923_v27  ;;  %s783_s17 = scalar_lea.vmem %s610_s4, 256  ;;  %p788_p1 = scmp.lt.s32.totalorder %s610_s4, %s610_s4 }
 0x585   :  { %v421_v25 = vrot.slane %v417_v24, %v923_v27  ;;  %p784_p0 = scmp.ne.s32.totalorder %s610_s4, %s783_s17  ;;  %p789_p2 = scmp.lt.s32.totalorder %s783_s17, %s783_s17 }
 0x586   :  { %581 = vrot.lane.b32.xlu1 %v400_v20, %s809_s22 }
 0x587   :  { %p790_p3 = por %p789_p2, %p788_p1 }
 0x589   :  { %p791_p4 = pnand %p790_p3, %p784_p0 }
 0x5ee   :  { %v410_v47 = vpop.xlane.xlu0 %409 }
 0x5f2   :  { %v566_v50 = vpop.permute.xlu0 %565 }
 0x5f6   :  { %v413_v49 = vpop.xlane.xlu1 %412  ;;  %v572_v54 = vpop.permute.xlu0 %571 }
 0x5fa   :  { %v568_v51 = vpop.permute.xlu1 %567  ;;  %v580_v62 = vpop.permute.xlu0 %579 }
 0x5fe   :  { %v574_v58 = vpop.permute.xlu1 %573 }
 0x602   :  { %v582_v8 = vpop.permute.xlu1 %581 }
 0x62c   :  { %v463_v26 = vpop.f32.mrf.mxu1 }
 0x62d   :  { %v464_v28 = vadd.f32 %v463_v26, %v421_v25 }
 0x62e   :  { %v696_v29 = vpop.f32.mrf.mxu1 }
 0x62f   :  { %775 = vtanh.f32 %v464_v28 }
 0x630   :  { %v466_v31 = vpop.f32.mrf.mxu1 }
 0x631   :  { %v467_v32 = vadd.f32 %v466_v31, %v421_v25 }
 0x632   :  { %v697_v33 = vpop.f32.mrf.mxu1 }
 0x633   :  { %777 = vtanh.f32 %v467_v32 }
 0x63c   :  { %v776_v35 = vpop.eup %775 }
 0x640   :  { %v778_v36 = vpop.eup %777 }
 0x641   :  { %v472_v37 = vpack.c.bf16 %v778_v36, %v776_v35 }
 0x643   :  { %707 = vmatmul.mubr.msk.bf16.vlgmr.msra.gmra.mxu1 %vm171_vm1, %v472_v37 }
 0x703   :  { %v548_v40 = vpop.f32.mrf.mxu1 }
 0x704   :  { %v549_v41 = vadd.f32 %v548_v40, %v486_v39 }
 0x705   :  { %v708_v42 = vpop.f32.mrf.mxu1 }
 0x706   :  { %v555_v43 = vmul.f32 0.5, %v549_v41 }
 0x707   :  { %v551_v44 = vpop.f32.mrf.mxu1 }
 0x708   :  { %779 = vtanh.f32 %v555_v43  ;;  %v552_v45 = vadd.f32 %v551_v44, %v486_v39 }
 0x709   :  { %v709_v46 = vpop.f32.mrf.mxu1 }
 0x70a   :  { %v556_v48 = vmul.f32 0.5, %v552_v45 }
 0x70c   :  { %781 = vtanh.f32 %v556_v48 }
 0x715   :  { %v780_v52 = vpop.eup %779 }
 0x716   :  { %v559_v55 = vadd.f32 1.0, %v780_v52 }
 0x718   :  { %v561_v57 = vmul.f32 0.5, %v559_v55 }
 0x719   :  { %v782_v27 = vpop.eup %781 }
 0x71a   :  { %v585_v59 = vsel %vm171_vm1, %v561_v57, %v954_v5  ;;  %v560_v60 = vadd.f32 1.0, %v782_v27 }
 0x71b   :  { %v588_v61 = vsel %vm587_vm9, %v585_v59, %v566_v50 }
 0x71c   :  { %v562_v63 = vmul.f32 0.5, %v560_v60  ;;  %v591_v0 = vsel %vm590_vm10, %v588_v61, %v572_v54 }
 0x71d   :  { %v594_v2 = vsel %vm593_vm11, %v591_v0, %v580_v62 }
 0x71e   :  { %v586_v3 = vsel %vm171_vm1, %v562_v63, %v963_v12  ;;  %v597_v4 = vsel %vm596_vm12, %v594_v2, %v410_v47 }
 0x71f   :  { %v589_v6 = vsel %vm587_vm9, %v586_v3, %v568_v51  ;;  %v600_v5 = vsel %vm599_vm13, %v597_v4, 0.0 }
 0x720   :  { %v592_v11 = vsel %vm590_vm10, %v589_v6, %v574_v58  ;;  %602 = vst [vmem:[#allocation2] sm:$0xff] %v600_v5 }
 0x721   :  { %v595_v9 = vsel %vm593_vm11, %v592_v11, %v582_v8 }
 0x722   :  { %v598_v14 = vsel %vm596_vm12, %v595_v9, %v413_v49 }
 0x723   :  { %v601_v15 = vsel %vm599_vm13, %v598_v14, 0.0 }
 0x724   :  { %603 = vst [vmem:[#allocation2 + $0x8] sm:$0xff] %v601_v15 }
 0x725   :  { %794 = shalt.err (!%p791_p4)
}
 0x726   :  { %s820_s18 = smov 128   ;;  %s821_s19 = smov 8  }
 0x727   :  { %615 = dma.vmem_to_hbm [thread:$0]  %s610_s4, 256, %s1060_s5, [#allocation3], %s820_s18, %s820_s18, %s821_s19  }
 0x728   :  { %803 = dma.done.wait [#allocation3], 256  }
 0x729   :  { %804 = vsyncadd [#allocation3], 4294967040 }
 0x72a   :  { %619 = vsyncpa [#allocation3], 1 }

</bundles_post_ra>
